<compile_context>
chip_gen: v7x
topology: tpu7x:2x2x1
jax: 0.10.0
libtpu: 0.0.40
codegen_flags: <defaults>
</compile_context>

<pallas_src>
import functools

import jax
import jax.numpy as jnp
from jax.experimental import pallas as pl
from jax.experimental.pallas import tpu as pltpu


def _round_up(x, m):
    return (x + m - 1) // m * m


def _self_output_kernel(x_ref, w_ref, b_ref, res_ref, gamma_ref, beta_ref,
                        o_ref, *, eps):
    # x_ref:   (tm, K)   attention output tile (native dtype)
    # w_ref:   (K, H)    dense weight, pre-transposed once outside the kernel
    # b_ref:   (1, H)    dense bias
    # res_ref: (tm, H)   residual (input_tensor) tile
    # gamma_ref/beta_ref: (1, H) LayerNorm affine params
    # o_ref:   (tm, H)
    #
    # MXU matmul in native input dtype, f32 accumulation.
    h = jnp.dot(x_ref[...], w_ref[...], preferred_element_type=jnp.float32)
    # Dropout is identity in eval mode.
    h = h + b_ref[...].astype(jnp.float32)
    h = h + res_ref[...].astype(jnp.float32)

    # LayerNorm over the hidden dim, kept in f32 (eps=1e-12 < bf16 resolution).
    mean = jnp.mean(h, axis=-1, keepdims=True)
    centered = h - mean
    var = jnp.mean(centered * centered, axis=-1, keepdims=True)
    y = centered * jax.lax.rsqrt(var + eps)
    y = y * gamma_ref[...].astype(jnp.float32) + beta_ref[...].astype(jnp.float32)

    # in_grow_dim is False and grow_mask_vec == 1.0, so no extra masking here.
    o_ref[...] = y.astype(o_ref.dtype)


def _const_spec(shape):
    """BlockSpec for a grid-invariant operand; single VMEM copy if supported."""
    idx = lambda i: (0,) * len(shape)
    try:
        return pl.BlockSpec(shape, idx, pipeline_mode=pl.Buffered(1))
    except Exception:  # pipeline_mode/Buffered not available in this version
        return pl.BlockSpec(shape, idx)


def bert_self_output_ex(hidden_states, input_tensor, kparams, *, eps=1e-12,
                        block_rows=512):
    """hidden_states: [B, S, K], input_tensor: [B, S, H] -> [B, S, H].

    `kparams` must come from prepare_params() (weight already (K, H))."""
    B, S, K = hidden_states.shape
    H = input_tensor.shape[-1]
    M = B * S

    w_t = kparams["dense_w_t"]        # (K, H), transposed once outside this path
    b = kparams["dense_b"]            # (1, H)
    gamma = kparams["ln_w"]           # (1, H)
    beta = kparams["ln_b"]            # (1, H)

    in_isz = jnp.dtype(hidden_states.dtype).itemsize
    res_isz = jnp.dtype(input_tensor.dtype).itemsize
    w_isz = jnp.dtype(w_t.dtype).itemsize

    # Row-tile sizing: large tiles amortize ~0.35us/grid-step overhead and fill
    # the MXU; clamp so double-buffered tiles + resident weight + f32 LN
    # temporaries fit a VMEM budget that is safe on v7x (64 MiB physical).
    vmem_budget = 40 * 1024 * 1024

    def vmem_bytes(t):
        total = 2 * t * K * in_isz            # x tile, double-buffered
        total += 2 * t * H * res_isz          # residual tile
        total += 2 * t * H * in_isz           # output tile
        total += 4 * t * H * 4                # f32 temporaries inside kernel
        total += 2 * K * H * w_isz            # weight (assume 2 bufs worst case)
        total += 6 * H * w_isz                # bias / gamma / beta
        return total

    tm = _round_up(min(block_rows, _round_up(M, 8)), 8)
    while tm > 8 and vmem_bytes(tm) > vmem_budget:
        tm = max(8, _round_up(tm // 2, 8))

    M_pad = _round_up(M, tm)
    x2 = hidden_states.reshape(M, K)
    r2 = input_tensor.reshape(M, H)
    if M_pad != M:
        x2 = jnp.pad(x2, ((0, M_pad - M), (0, 0)))
        r2 = jnp.pad(r2, ((0, M_pad - M), (0, 0)))

    grid = (M_pad // tm,)

    out = pl.pallas_call(
        functools.partial(_self_output_kernel, eps=eps),
        out_shape=jax.ShapeDtypeStruct((M_pad, H), hidden_states.dtype),
        grid_spec=pltpu.PrefetchScalarGridSpec(
            num_scalar_prefetch=0,
            grid=grid,
            in_specs=[
                pl.BlockSpec((tm, K), lambda i: (i, 0)),   # x tile
                _const_spec((K, H)),                       # weight (resident)
                _const_spec((1, H)),                       # bias
                pl.BlockSpec((tm, H), lambda i: (i, 0)),   # residual tile
                _const_spec((1, H)),                       # LN gamma
                _const_spec((1, H)),                       # LN beta
            ],
            out_specs=pl.BlockSpec((tm, H), lambda i: (i, 0)),
        ),
        compiler_params=pltpu.CompilerParams(
            dimension_semantics=("parallel",),             # v7x: 2 TCs split M
            vmem_limit_bytes=48 * 1024 * 1024),
    )(x2, w_t, b, r2, gamma, beta)

    if M_pad != M:
        out = out[:M]
    return out.reshape(B, S, H)


def init_params(key, num_attention_heads, hidden_size, dtype=jnp.float32):
    """PyTorch-layout params (nn.Linear weight is (out_dim, in_dim))."""
    head_size = 64  # CONSTANT_ATTENTION_HEAD_SIZE
    in_dim = head_size * num_attention_heads
    k1, k2 = jax.random.split(key)
    bound = 1.0 / (in_dim ** 0.5)
    return {
        "dense_w": jax.random.uniform(k1, (hidden_size, in_dim), dtype,
                                      minval=-bound, maxval=bound),
        "dense_b": jax.random.uniform(k2, (hidden_size,), dtype,
                                      minval=-bound, maxval=bound),
        "ln_w": jnp.ones((hidden_size,), dtype),
        "ln_b": jnp.zeros((hidden_size,), dtype),
    }


def prepare_params(params):
    """One-time layout prep (outside the per-call path): transpose the dense
    weight to (in_dim, out_dim) and reshape the vectors to (1, H)."""
    H = params["dense_w"].shape[0]
    return {
        "dense_w_t": jnp.asarray(params["dense_w"]).T,   # (K, H)
        "dense_b": params["dense_b"].reshape(1, H),
        "ln_w": params["ln_w"].reshape(1, H),
        "ln_b": params["ln_b"].reshape(1, H),
    }


def reference(hidden_states, input_tensor, params, eps=1e-12):
    h = jnp.einsum("bsk,hk->bsh", hidden_states, params["dense_w"]) + params["dense_b"]
    h = h + input_tensor
    mean = jnp.mean(h, axis=-1, keepdims=True)
    var = jnp.mean((h - mean) ** 2, axis=-1, keepdims=True)
    return (h - mean) * jax.lax.rsqrt(var + eps) * params["ln_w"] + params["ln_b"]


if __name__ == "__main__":
    # config: num_attention_heads=1 (-> in_dim=64), hidden_size=32, eps=1e-12
    NUM_HEADS, HIDDEN = 1, 32
    IN_DIM = 64 * NUM_HEADS
    EPS = 1e-12

    key = jax.random.PRNGKey(0)
    kx, kr, kp = jax.random.split(key, 3)
    params = init_params(kp, NUM_HEADS, HIDDEN)
    kparams = prepare_params(params)   # one-time weight transpose, not per call

    # Case 1: even B*S (no padding path).
    B, S = 2, 8
    hidden_states = jax.random.normal(kx, (B, S, IN_DIM), jnp.float32)
    input_tensor = jax.random.normal(kr, (B, S, HIDDEN), jnp.float32)
    out = bert_self_output_ex(hidden_states, input_tensor, kparams, eps=EPS)
    jax.block_until_ready(out)
    ref = reference(hidden_states, input_tensor, params, eps=EPS)
    assert out.shape == (B, S, HIDDEN)
    assert jnp.allclose(out, ref, atol=1e-4, rtol=1e-4), "mismatch vs reference (case 1)"

    # Case 2: ragged B*S (exercises the zero-pad + slice path).
    B2, S2 = 3, 5
    kx2, kr2 = jax.random.split(kx)
    hs2 = jax.random.normal(kx2, (B2, S2, IN_DIM), jnp.float32)
    it2 = jax.random.normal(kr2, (B2, S2, HIDDEN), jnp.float32)
    out2 = bert_self_output_ex(hs2, it2, kparams, eps=EPS)
    jax.block_until_ready(out2)
    ref2 = reference(hs2, it2, params, eps=EPS)
    assert out2.shape == (B2, S2, HIDDEN)
    assert jnp.allclose(out2, ref2, atol=1e-4, rtol=1e-4), "mismatch vs reference (case 2)"

    print("KERNEL_OK")
</pallas_src>

<mosaic_0001>
module attributes {stable_mosaic.version = 11 : i64} {
  func.func @_self_output_kernel(%arg0: i32, %arg1: memref<16x64xf32, #tpu.memory_space<vmem>>, %arg2: memref<64x32xf32, #tpu.memory_space<vmem>>, %arg3: memref<1x32xf32, #tpu.memory_space<vmem>>, %arg4: memref<16x32xf32, #tpu.memory_space<vmem>>, %arg5: memref<1x32xf32, #tpu.memory_space<vmem>>, %arg6: memref<1x32xf32, #tpu.memory_space<vmem>>, %arg7: memref<16x32xf32, #tpu.memory_space<vmem>>) attributes {dimension_semantics = [#tpu.dimension_semantics<parallel>], iteration_bounds = array<i64: 1>, scalar_prefetch = 0 : i64, scratch_operands = 0 : i64, tpu.core_type = #tpu.core_type<tc>, window_params = [{transform_indices = @transform_0, window_bounds = array<i64: 16, 64>}, {pipeline_mode = #tpu.pipeline_mode<synchronous>, transform_indices = @transform_1, window_bounds = array<i64: 64, 32>}, {pipeline_mode = #tpu.pipeline_mode<synchronous>, transform_indices = @transform_2, window_bounds = array<i64: 1, 32>}, {transform_indices = @transform_3, window_bounds = array<i64: 16, 32>}, {pipeline_mode = #tpu.pipeline_mode<synchronous>, transform_indices = @transform_4, window_bounds = array<i64: 1, 32>}, {pipeline_mode = #tpu.pipeline_mode<synchronous>, transform_indices = @transform_5, window_bounds = array<i64: 1, 32>}, {transform_indices = @transform_6, window_bounds = array<i64: 16, 32>}]} {
    %c0 = arith.constant 0 : index
    %c0_0 = arith.constant 0 : index
    %0 = vector.load %arg1[%c0, %c0_0] : memref<16x64xf32, #tpu.memory_space<vmem>>, vector<16x64xf32>
    %c0_1 = arith.constant 0 : index
    %c0_2 = arith.constant 0 : index
    %1 = vector.load %arg2[%c0_1, %c0_2] : memref<64x32xf32, #tpu.memory_space<vmem>>, vector<64x32xf32>
    %cst = arith.constant dense<0.000000e+00> : vector<16x32xf32>
    %2 = tpu.matmul %0, %1, %cst {dimension_numbers = #tpu.dot_dimension_numbers<[1], [0], [0], [1], [0, 0, 1, 1], [], []>} : vector<16x64xf32>, vector<64x32xf32>, vector<16x32xf32> -> vector<16x32xf32>
    %c0_3 = arith.constant 0 : index
    %c0_4 = arith.constant 0 : index
    %3 = vector.load %arg3[%c0_3, %c0_4] : memref<1x32xf32, #tpu.memory_space<vmem>>, vector<1x32xf32>
    %4 = vector.broadcast %3 : vector<1x32xf32> to vector<16x32xf32>
    %5 = arith.addf %2, %4 : vector<16x32xf32>
    %c0_5 = arith.constant 0 : index
    %c0_6 = arith.constant 0 : index
    %6 = vector.load %arg4[%c0_5, %c0_6] : memref<16x32xf32, #tpu.memory_space<vmem>>, vector<16x32xf32>
    %7 = arith.addf %5, %6 : vector<16x32xf32>
    %cst_7 = arith.constant dense<0.000000e+00> : vector<16xf32>
    %8 = vector.multi_reduction <add>, %7, %cst_7 [1] : vector<16x32xf32> to vector<16xf32>
    %9 = vector.shape_cast %8 : vector<16xf32> to vector<16x1xf32>
    %cst_8 = arith.constant 3.200000e+01 : f32
    %10 = vector.broadcast %cst_8 : f32 to vector<16x1xf32>
    %11 = arith.divf %9, %10 : vector<16x1xf32>
    %12 = vector.broadcast %11 : vector<16x1xf32> to vector<16x32xf32>
    %13 = arith.subf %7, %12 : vector<16x32xf32>
    %14 = arith.mulf %13, %13 : vector<16x32xf32>
    %cst_9 = arith.constant dense<0.000000e+00> : vector<16xf32>
    %15 = vector.multi_reduction <add>, %14, %cst_9 [1] : vector<16x32xf32> to vector<16xf32>
    %16 = vector.shape_cast %15 : vector<16xf32> to vector<16x1xf32>
    %cst_10 = arith.constant 3.200000e+01 : f32
    %17 = vector.broadcast %cst_10 : f32 to vector<16x1xf32>
    %18 = arith.divf %16, %17 : vector<16x1xf32>
    %cst_11 = arith.constant 9.99999996E-13 : f32
    %19 = vector.broadcast %cst_11 : f32 to vector<16x1xf32>
    %20 = arith.addf %18, %19 : vector<16x1xf32>
    %21 = math.rsqrt %20 : vector<16x1xf32>
    %22 = vector.broadcast %21 : vector<16x1xf32> to vector<16x32xf32>
    %23 = arith.mulf %13, %22 : vector<16x32xf32>
    %c0_12 = arith.constant 0 : index
    %c0_13 = arith.constant 0 : index
    %24 = vector.load %arg5[%c0_12, %c0_13] : memref<1x32xf32, #tpu.memory_space<vmem>>, vector<1x32xf32>
    %25 = vector.broadcast %24 : vector<1x32xf32> to vector<16x32xf32>
    %26 = arith.mulf %23, %25 : vector<16x32xf32>
    %c0_14 = arith.constant 0 : index
    %c0_15 = arith.constant 0 : index
    %27 = vector.load %arg6[%c0_14, %c0_15] : memref<1x32xf32, #tpu.memory_space<vmem>>, vector<1x32xf32>
    %28 = vector.broadcast %27 : vector<1x32xf32> to vector<16x32xf32>
    %29 = arith.addf %26, %28 : vector<16x32xf32>
    %c0_16 = arith.constant 0 : index
    %c0_17 = arith.constant 0 : index
    %30 = vector.load %arg7[%c0_16, %c0_17] : memref<16x32xf32, #tpu.memory_space<vmem>>, vector<16x32xf32>
    tpu.vector_store %arg7[%c0_16, %c0_17], %29 {strides = array<i32>} : memref<16x32xf32, #tpu.memory_space<vmem>>, vector<16x32xf32>,
    return
  }
  func.func @transform_0(%arg0: i32) -> (i32, i32) {
    %c0_i32 = arith.constant 0 : i32
    %c0_i32_0 = arith.constant 0 : i32
    return %arg0, %c0_i32 : i32, i32
  }
  func.func @transform_1(%arg0: i32) -> (i32, i32) {
    %c0_i32 = arith.constant 0 : i32
    %c0_i32_0 = arith.constant 0 : i32
    %c0_i32_1 = arith.constant 0 : i32
    return %c0_i32, %c0_i32_0 : i32, i32
  }
  func.func @transform_2(%arg0: i32) -> (i32, i32) {
    %c0_i32 = arith.constant 0 : i32
    %c0_i32_0 = arith.constant 0 : i32
    %c0_i32_1 = arith.constant 0 : i32
    return %c0_i32, %c0_i32_0 : i32, i32
  }
  func.func @transform_3(%arg0: i32) -> (i32, i32) {
    %c0_i32 = arith.constant 0 : i32
    %c0_i32_0 = arith.constant 0 : i32
    return %arg0, %c0_i32 : i32, i32
  }
  func.func @transform_4(%arg0: i32) -> (i32, i32) {
    %c0_i32 = arith.constant 0 : i32
    %c0_i32_0 = arith.constant 0 : i32
    %c0_i32_1 = arith.constant 0 : i32
    return %c0_i32, %c0_i32_0 : i32, i32
  }
  func.func @transform_5(%arg0: i32) -> (i32, i32) {
    %c0_i32 = arith.constant 0 : i32
    %c0_i32_0 = arith.constant 0 : i32
    %c0_i32_1 = arith.constant 0 : i32
    return %c0_i32, %c0_i32_0 : i32, i32
  }
  func.func @transform_6(%arg0: i32) -> (i32, i32) {
    %c0_i32 = arith.constant 0 : i32
    %c0_i32_0 = arith.constant 0 : i32
    return %arg0, %c0_i32 : i32, i32
  }
}

</mosaic_0001>

<bundles_post_ra>
// kernel: tpu_custom_call.1
= control target key start
LH: loop header
LB: loop body
LE: loop exit
PB: predicated region body
PF: predicated region fallthrough
CT: control target
= control target key end

     0   :  { %vm41_vm0 = vcmask 523264   ;;  %s375_s0 = inlined_call_operand.vmem [shape: f32[16,64], index: 0, kind: input, shape index: {}]   ;;  %s376_s1 = inlined_call_operand.vmem [shape: f32[64,32], index: 1, kind: input, shape index: {}]   ;;  %s377_s2 = inlined_call_operand.vmem [shape: f32[1,32], index: 2, kind: input, shape index: {}]   ;;  %s378_s3 = inlined_call_operand.vmem [shape: f32[16,32], index: 3, kind: input, shape index: {}]   ;;  %s379_s4 = inlined_call_operand.vmem [shape: f32[1,32], index: 4, kind: input, shape index: {}]   ;;  %s380_s5 = inlined_call_operand.vmem [shape: f32[1,32], index: 5, kind: input, shape index: {}]   ;;  %s381_s6 = inlined_call_operand.hbm [shape: f32[16,32], index: 6, kind: output, shape index: {}]  }
   0x1   :  { %v26_v0 = vld [vmem:[%s376_s1] sm:$0xff]  ;;  %v27_v1 = vld [vmem:[%s376_s1 + $0x8] sm:$0xff]  ;;  %v28_v2 = vld [vmem:[%s376_s1 + $0x10] sm:$0xff] }
   0x2   :  { %v225_v3 = vpack.c.bf16 %v27_v1, %v26_v0  ;;  %v29_v4 = vld [vmem:[%s376_s1 + $0x18] sm:$0xff]  ;;  %v30_v6 = vld [vmem:[%s376_s1 + $0x20] sm:$0xff]  ;;  %v31_v7 = vld [vmem:[%s376_s1 + $0x28] sm:$0xff] }
   0x3   :  { %v229_v5 = vpack.c.bf16 %v29_v4, %v28_v2  ;;  %v24_v8 = vld [vmem:[%s375_s0] sm:$0xff] }
   0x4   :  { %226 = vmatprep.subr.bf16.mxu0 %v225_v3  ;;  %222 = vmatprep.mubr.msk.f32.mxu0 %vm41_vm0, %v24_v8 }
   0x5   :  { %11 = vsyncpa [#allocation3], 0  ;;  %228 = vmatpush3.bf16.msra.mxu0 %v225_v3  ;;  %v233_v9 = vpack.c.bf16 %v31_v7, %v30_v6  ;;  %v32_v10 = vld [vmem:[%s376_s1 + $0x30] sm:$0xff]  ;;  %v33_v11 = vld [vmem:[%s376_s1 + $0x38] sm:$0xff]  ;;  %vm127_vm1 = vcmask 261120   ;;  %s272_s23 = smov [#allocation2]  }
   0x6   :  { %230 = vmatprep.subr.bf16.mxu0 %v229_v5  ;;  %v237_v12 = vpack.c.bf16 %v33_v11, %v32_v10  ;;  %v25_v13 = vld [vmem:[%s375_s0 + $0x8] sm:$0xff]  ;;  %v191_v14 = vld [vmem:[%s377_s2] ss:$0 sm:$0xff]  ;;  %s180_s24 = sshll.u32 %s272_s23, 4  ;;  %s181_s24 = int_to_ptr.vmem [resolvable:$true] %s180_s24 }
   0x7   :  { %v123_v17 = vld [vmem:[%s378_s3] sm:$0xff]  ;;  %v124_v20 = vld [vmem:[%s378_s3 + $0x8] sm:$0xff]  ;;  %s248_s25 = scalar_lea.vmem %s181_s24, 256  ;;  %p253_p1 = scmp.lt.s32.totalorder %s181_s24, %s181_s24 }
   0x8   :  { %v194_v42 = vld [vmem:[%s379_s4] ss:$0 sm:$0xff]  ;;  %p249_p0 = scmp.ne.s32.totalorder %s181_s24, %s248_s25  ;;  %p254_p2 = scmp.lt.s32.totalorder %s248_s25, %s248_s25 }
   0x9   :  { %232 = vmatpush3.bf16.msra.mxu0 %v229_v5  ;;  %v195_v44 = vld [vmem:[%s380_s5] ss:$0 sm:$0xff] }
   0xa   :  { %234 = vmatprep.subr.bf16.mxu0 %v233_v9  ;;  %p255_p3 = por %p254_p2, %p253_p1 }
   0xc   :  { %p256_p4 = pnand %p255_p3, %p249_p0 }
   0xd   :  { %236 = vmatpush3.bf16.msra.mxu0 %v233_v9 }
   0xe   :  { %238 = vmatprep.subr.bf16.mxu0 %v237_v12 }
  0x11   :  { %240 = vmatpush3.bf16.msra.mxu0 %v237_v12 }
  0x14   :  { %223 = vmatmul.mubr.msk.f32.vlgmr.msra.gmra.mrb[0].mxu0 %vm41_vm0, %v25_v13 }
  0xe7   :  { %v224_v15 = vpop.f32.mrb[0].mxu0 }
  0xe8   :  { %v114_v16 = vpop.f32.mrb[1].mxu0  ;;  %v120_v18 = vadd.f32 %v224_v15, %v191_v14 }
  0xe9   :  { %v115_v19 = vadd.f32 %v191_v14, %v114_v16 }
  0xea   :  { %v126_v23 = vadd.f32 %v124_v20, %v120_v18 }
  0xeb   :  { %v125_v21 = vadd.f32 %v123_v17, %v115_v19 }
  0xec   :  { %v131_v24 = vsel %vm127_vm1, %v126_v23, 0.0 }
  0xed   :  { %v128_v22 = vsel %vm127_vm1, %v125_v21, 0.0 }
  0xee   :  { %129 = vadd.xlane.f32.xlu0 %v128_v22 }
  0xf2   :  { %132 = vadd.xlane.f32.xlu0 %v131_v24 }
 0x17b   :  { %v130_v25 = vpop.xlane.xlu0 %129 }
 0x17c   :  { %v135_v26 = vmul.f32 0.03125, %v130_v25 }
 0x17e   :  { %v137_v27 = vsub.f32 %v125_v21, %v135_v26 }
 0x17f   :  { %v133_v28 = vpop.xlane.xlu0 %132 }
 0x180   :  { %v136_v29 = vmul.f32 0.03125, %v133_v28  ;;  %v139_v30 = vmul.f32 %v137_v27, %v137_v27 }
 0x182   :  { %v138_v31 = vsub.f32 %v126_v23, %v136_v29  ;;  %v141_v32 = vsel %vm127_vm1, %v139_v30, 0.0 }
 0x183   :  { %142 = vadd.xlane.f32.xlu1 %v141_v32 }
 0x184   :  { %v140_v33 = vmul.f32 %v138_v31, %v138_v31 }
 0x186   :  { %v144_v34 = vsel %vm127_vm1, %v140_v33, 0.0 }
 0x187   :  { %145 = vadd.xlane.f32.xlu1 %v144_v34 }
 0x210   :  { %v143_v35 = vpop.xlane.xlu1 %142 }
 0x211   :  { %v147_v36 = vmul.f32 0.03125, %v143_v35 }
 0x213   :  { %v149_v37 = vadd.f32 1e-12, %v147_v36 }
 0x214   :  { %v146_v38 = vpop.xlane.xlu1 %145 }
 0x215   :  { %244 = vrsqrt.f32 %v149_v37  ;;  %v148_v39 = vmul.f32 0.03125, %v146_v38 }
 0x217   :  { %v150_v40 = vadd.f32 1e-12, %v148_v39 }
 0x219   :  { %246 = vrsqrt.f32 %v150_v40 }
 0x21f   :  { %v245_v41 = vpop.eup %244 }
 0x220   :  { %v153_v43 = vmul.f32 %v245_v41, %v137_v27 }
 0x222   :  { %v162_v45 = vmul.f32 %v194_v42, %v153_v43 }
 0x223   :  { %v247_v46 = vpop.eup %246 }
 0x224   :  { %v154_v47 = vmul.f32 %v247_v46, %v138_v31  ;;  %v171_v48 = vadd.f32 %v195_v44, %v162_v45 }
 0x226   :  { %v163_v49 = vmul.f32 %v194_v42, %v154_v47  ;;  %173 = vst.msk [vmem:[#allocation2] sm:$0xff] %vm127_vm1, %v171_v48 }
 0x228   :  { %v172_v50 = vadd.f32 %v195_v44, %v163_v49 }
 0x22a   :  { %174 = vst.msk [vmem:[#allocation2 + $0x8] sm:$0xff] %vm127_vm1, %v172_v50 }
 0x22b   :  { %259 = shalt.err (!%p256_p4)
}
 0x22c   :  { %s260_s26 = scalar_lea.hbm %s381_s6, 256 }
 0x22d   :  { %p261_p5 = scmp.ne.s32.totalorder %s381_s6, %s260_s26  ;;  %p264_p6 = scmp.lt.u32.totalorder %s260_s26, %s381_s6 }
 0x22f   :  { %p266_p7 = pnand %p264_p6, %p261_p5 }
 0x231   :  { %269 = shalt.err (!%p266_p7)
}
 0x232   :  { %s273_s7 = smov 128   ;;  %s274_s8 = smov 8  }
 0x233   :  { %186 = dma.vmem_to_hbm [thread:$0]  %s181_s24, 256, %s381_s6, [#allocation3], %s273_s7, %s273_s7, %s274_s8  }
 0x234   :  { %270 = dma.done.wait [#allocation3], 256  }
 0x235   :  { %271 = vsyncadd [#allocation3], 4294967040 }
 0x236   :  { %190 = vsyncpa [#allocation3], 1 }

</bundles_post_ra>
